<compile_context>
chip_gen: v5e
topology: v5e:2x2
jax: 0.10.0
libtpu: 0.0.40
codegen_flags: <defaults>
</compile_context>

<pallas_src>
import functools

import jax
import jax.numpy as jnp
from jax.experimental import pallas as pl
from jax.experimental.pallas import tpu as pltpu

# ----------------------------------------------------------------------------
# Static architecture constants (Python ints => never traced by jit)
# ----------------------------------------------------------------------------
B = 2              # batch used in __main__
C_IN = 4           # input channels
IMG = 16           # spatial size (H == W)
K = 2              # conv kernel == stride for both convs
C1 = 16            # conv1 output channels
C2 = 32            # conv2 output channels
LATENT = 32        # latent_dim
HIDDEN = 64        # MLP hidden
N_CONCEPTS = 10    # n_concepts
S_DIM = 8          # s_dim (unused: inner_state is None in forward)

PAD = 128                        # lane-dense width for the final outputs only
F1 = K * K * C_IN                # features per conv1 patch (16)
N_POS = K * K                    # conv1 patches per conv2 patch (2x2 = 4)
NS2 = (IMG // (K * K)) ** 2      # conv2 spatial positions per image (4*4 = 16)


# ----------------------------------------------------------------------------
# Fused Pallas kernel: conv1 -> conv2 -> proj -> fc1 -> out -> (softmax, logsoftmax)
# ----------------------------------------------------------------------------
def _fused_kernel(p1_ref, w1_ref, b1_ref, w2_ref, b2_ref, wp_ref, bp_ref,
                  wf_ref, bf_ref, wo_ref, bo_ref, ps_ref, logps_ref, h2t_ref,
                  *, b_pad, ns2, c2, n_concepts):
    def mm(a, w_ref):
        # bf16 x bf16 on the MXU with fp32 accumulation; weights are already bf16
        # (astype on the bf16 input p1 is a no-op).
        return jnp.dot(a.astype(jnp.bfloat16), w_ref[...],
                       preferred_element_type=jnp.float32)

    # conv1: block-diagonal weight over the 4 conv1-patch positions, so the
    # output lanes are already ordered (p, c1).  rows = (s2, b).
    h1 = jnp.maximum(mm(p1_ref[...], w1_ref) + b1_ref[...], 0.0)   # (ns2*b_pad, 4*C1)

    # conv2: ONE contraction over K = (p, c1) = 64 (was 4 dots + 3 adds).
    h2 = jnp.maximum(mm(h1, w2_ref) + b2_ref[...], 0.0)            # (ns2*b_pad, C2)

    # Re-layout (s2, b)-rows -> b-rows with lanes (s2, c2): 16 static sublane
    # slices + lane-offset stores into a VMEM scratch (vst slot, no MXU).
    for s in range(ns2):
        h2t_ref[:, s * c2:(s + 1) * c2] = h2[s * b_pad:(s + 1) * b_pad, :]

    # flatten -> latent: ONE K = ns2*c2 = 512 contraction
    # (was 16 serialized M=8 dots + 15 VPU adds).
    z = jnp.maximum(mm(h2t_ref[...], wp_ref) + bp_ref[...], 0.0)   # (b_pad, LATENT)

    # MLP head.
    h = jnp.maximum(mm(z, wf_ref) + bf_ref[...], 0.0)              # (b_pad, HIDDEN)
    logits = mm(h, wo_ref) + bo_ref[...]                           # (b_pad, 128)

    # Masked, numerically stable softmax + log_softmax over the first n_concepts
    # lanes (padded lanes -> prob 0 / logprob ~ -1e30; wrapper slices them away).
    lane = jax.lax.broadcasted_iota(jnp.int32, logits.shape, 1)
    valid = lane < n_concepts
    logits = jnp.where(valid, logits, -1e30)
    m = jnp.max(logits, axis=-1, keepdims=True)
    zs = logits - m
    e = jnp.where(valid, jnp.exp(zs), 0.0)
    s_sum = jnp.sum(e, axis=-1, keepdims=True)
    ps_ref[...] = e * pl.reciprocal(s_sum, approx=True)            # divide on the EUP
    logps_ref[...] = zs - jnp.log(s_sum)


def _fused_forward(p1, params, b_pad):
    kernel = functools.partial(_fused_kernel, b_pad=b_pad, ns2=NS2, c2=C2,
                               n_concepts=N_CONCEPTS)
    vmem = pl.BlockSpec(memory_space=pltpu.MemorySpace.VMEM)
    out_shape = jax.ShapeDtypeStruct((b_pad, PAD), jnp.float32)
    return pl.pallas_call(
        kernel,
        out_shape=(out_shape, out_shape),
        in_specs=[vmem] * 11,
        out_specs=(vmem, vmem),
        scratch_shapes=[pltpu.VMEM((b_pad, NS2 * C2), jnp.float32)],
        compiler_params=pltpu.CompilerParams(
            # allow XLA to fuse the wrapper-side patchify transpose into the p1
            # operand (weights are plain parameters: no fusion).
            allow_input_fusion=[True] + [False] * 10),
    )(p1, params["w1"], params["b1"], params["w2"], params["b2"],
      params["wp"], params["bp"], params["wf"], params["bf"],
      params["wo"], params["bo"])


# ----------------------------------------------------------------------------
# Wrapper glue: two-level im2col (pure reshape/transpose on the raw input)
# ----------------------------------------------------------------------------
def _patchify_two_level(x_nhwc):
    """(B,H,W,C) -> (NS2*B, N_POS*F1) bf16.
    Rows ordered (s2, b); lanes ordered (p, kh, kw, c) where p = conv1-patch
    position inside its conv2 patch and s2 = conv2 spatial index."""
    bp, h, w, c = x_nhwc.shape
    h4, w4 = h // (K * K), w // (K * K)
    x = x_nhwc.reshape(bp, h4, K, K, w4, K, K, c)      # b, i2, dh, kh, j2, dw, kw, c
    x = jnp.transpose(x, (1, 4, 0, 2, 5, 3, 6, 7))      # i2, j2, b, dh, dw, kh, kw, c
    return x.reshape(h4 * w4 * bp, N_POS * F1).astype(jnp.bfloat16)


# ----------------------------------------------------------------------------
# Parameters (created directly in padded, kernel-ready layout; weights bf16)
# ----------------------------------------------------------------------------
def init_params(key):
    ks = jax.random.split(key, 10)

    def rnd(k_, shape, fan_in):
        return jax.random.normal(k_, shape, jnp.float32) / jnp.sqrt(float(fan_in))

    # conv1 weight in im2col layout ((kh,kw,c_in) -> c1), expanded block-diagonally
    # over the N_POS conv1-patch positions so its matmul output lanes are (p, c1).
    w1c = rnd(ks[0], (F1, C1), F1)
    w1 = jnp.zeros((N_POS * F1, N_POS * C1), jnp.float32)
    for p in range(N_POS):
        w1 = w1.at[p * F1:(p + 1) * F1, p * C1:(p + 1) * C1].set(w1c)
    b1 = jnp.tile(rnd(ks[1], (1, C1), F1), (1, N_POS))          # (1, 64)

    # conv2: (p, c1) -> c2 (K-dim NOT padded to 128).
    w2 = rnd(ks[2], (N_POS * C1, C2), N_POS * C1)               # (64, 32)
    b2 = rnd(ks[3], (1, C2), N_POS * C1)

    # flatten -> latent: (s2, c2) -> latent (K-dim NOT padded to 128).
    wp = rnd(ks[4], (NS2 * C2, LATENT), NS2 * C2)               # (512, 32)
    bp = rnd(ks[5], (1, LATENT), NS2 * C2)

    # MLP head; only the output layer is padded to 128 lanes (lane-dense store).
    wf = rnd(ks[6], (LATENT, HIDDEN), LATENT)                   # (32, 64)
    bf = rnd(ks[7], (1, HIDDEN), LATENT)
    wo = jnp.zeros((HIDDEN, PAD), jnp.float32).at[:, :N_CONCEPTS].set(
        rnd(ks[8], (HIDDEN, N_CONCEPTS), HIDDEN))               # (64, 128)
    bo = jnp.zeros((1, PAD), jnp.float32).at[:, :N_CONCEPTS].set(
        rnd(ks[9], (1, N_CONCEPTS), HIDDEN))

    tobf = lambda a: a.astype(jnp.bfloat16)                     # weights bf16
    return {
        "w1": tobf(w1), "b1": b1, "w2": tobf(w2), "b2": b2,     # biases stay fp32
        "wp": tobf(wp), "bp": bp, "wf": tobf(wf), "bf": bf,
        "wo": tobf(wo), "bo": bo,
    }


# ----------------------------------------------------------------------------
# Forward pass of visual_S_concept_Net
# ----------------------------------------------------------------------------
def visual_s_concept_net_forward(params, inner_state, outer_state):
    """Matches visual_S_concept_Net.forward: classifier(None, outer_state).
    outer_state: (B, C, H, W) float32 (PyTorch NCHW)."""
    del inner_state  # forward passes None to the classifier

    x = jnp.transpose(outer_state, (0, 2, 3, 1))        # NCHW -> NHWC
    b = x.shape[0]
    b_pad = max(8, -(-b // 8) * 8)                      # 8-aligned batch (MXU M)
    if b_pad != b:
        x = jnp.pad(x, ((0, b_pad - b), (0, 0), (0, 0), (0, 0)))

    # TODO(synk): fully in-kernel patchify of the raw NCHW tensor would need
    # in-kernel gathers/transposes; kept as a wrapper reshape/transpose that
    # XLA may fuse into the operand (allow_input_fusion).
    p1 = _patchify_two_level(x)
    ps_pad, logps_pad = _fused_forward(p1, params, b_pad)

    # Slice away batch / lane padding in the wrapper.
    return ps_pad[:b, :N_CONCEPTS], logps_pad[:b, :N_CONCEPTS]


# ----------------------------------------------------------------------------
# Plain-jnp reference (same bf16 matmul math) for a correctness check
# ----------------------------------------------------------------------------
def _reference_forward(params, outer_state):
    x = jnp.transpose(outer_state, (0, 2, 3, 1))
    b = x.shape[0]
    b_pad = max(8, -(-b // 8) * 8)
    if b_pad != b:
        x = jnp.pad(x, ((0, b_pad - b), (0, 0), (0, 0), (0, 0)))
    p1 = _patchify_two_level(x)
    mm = lambda a, w: jnp.dot(a.astype(jnp.bfloat16), w,
                              preferred_element_type=jnp.float32)
    h1 = jnp.maximum(mm(p1, params["w1"]) + params["b1"], 0.0)
    h2 = jnp.maximum(mm(h1, params["w2"]) + params["b2"], 0.0)
    h2t = h2.reshape(NS2, b_pad, C2).transpose(1, 0, 2).reshape(b_pad, NS2 * C2)
    z = jnp.maximum(mm(h2t, params["wp"]) + params["bp"], 0.0)
    h = jnp.maximum(mm(z, params["wf"]) + params["bf"], 0.0)
    logits = (mm(h, params["wo"]) + params["bo"])[:, :N_CONCEPTS]
    logps = jax.nn.log_softmax(logits, axis=-1)
    return jnp.exp(logps)[:b], logps[:b]


# ----------------------------------------------------------------------------
if __name__ == "__main__":
    key = jax.random.PRNGKey(0)
    k_param, k_data = jax.random.split(key)

    params = init_params(k_param)
    outer_state = jax.random.normal(k_data, (B, C_IN, IMG, IMG), jnp.float32)

    fwd = jax.jit(lambda p, o: visual_s_concept_net_forward(p, None, o))
    PS_s, log_PS_s = fwd(params, outer_state)
    jax.block_until_ready((PS_s, log_PS_s))

    assert PS_s.shape == (B, N_CONCEPTS)
    assert log_PS_s.shape == (B, N_CONCEPTS)
    assert bool(jnp.all(jnp.isfinite(PS_s))) and bool(jnp.all(jnp.isfinite(log_PS_s)))
    # approx-reciprocal softmax => ~1e-4-level deviation; use 1e-3 tolerances.
    assert bool(jnp.allclose(jnp.sum(PS_s, axis=-1), 1.0, atol=1e-3))
    assert bool(jnp.allclose(jnp.exp(log_PS_s), PS_s, atol=1e-3))

    ps_ref, logps_ref = _reference_forward(params, outer_state)
    assert bool(jnp.allclose(PS_s, ps_ref, atol=2e-3))
    assert bool(jnp.allclose(log_PS_s, logps_ref, atol=2e-3, rtol=1e-3))

    print("KERNEL_OK")
</pallas_src>

<mosaic_0001>
module attributes {stable_mosaic.version = 11 : i64} {
  func.func @_fused_kernel(%arg0: memref<128x64xbf16, #tpu.memory_space<vmem>>, %arg1: memref<64x64xbf16, #tpu.memory_space<vmem>>, %arg2: memref<1x64xf32, #tpu.memory_space<vmem>>, %arg3: memref<64x32xbf16, #tpu.memory_space<vmem>>, %arg4: memref<1x32xf32, #tpu.memory_space<vmem>>, %arg5: memref<512x32xbf16, #tpu.memory_space<vmem>>, %arg6: memref<1x32xf32, #tpu.memory_space<vmem>>, %arg7: memref<32x64xbf16, #tpu.memory_space<vmem>>, %arg8: memref<1x64xf32, #tpu.memory_space<vmem>>, %arg9: memref<64x128xbf16, #tpu.memory_space<vmem>>, %arg10: memref<1x128xf32, #tpu.memory_space<vmem>>, %arg11: memref<8x128xf32, #tpu.memory_space<vmem>>, %arg12: memref<8x128xf32, #tpu.memory_space<vmem>>, %arg13: memref<8x512xf32, #tpu.memory_space<vmem>>) attributes {dimension_semantics = [], scalar_prefetch = 0 : i64, scratch_operands = 1 : i64, tpu.core_type = #tpu.core_type<tc>} {
    %c0 = arith.constant 0 : index
    %c0_0 = arith.constant 0 : index
    %0 = vector.load %arg0[%c0, %c0_0] : memref<128x64xbf16, #tpu.memory_space<vmem>>, vector<128x64xbf16>
    %c0_1 = arith.constant 0 : index
    %c0_2 = arith.constant 0 : index
    %1 = vector.load %arg1[%c0_1, %c0_2] : memref<64x64xbf16, #tpu.memory_space<vmem>>, vector<64x64xbf16>
    %cst = arith.constant dense<0.000000e+00> : vector<128x64xf32>
    %2 = tpu.matmul %0, %1, %cst {dimension_numbers = #tpu.dot_dimension_numbers<[1], [0], [0], [1], [0, 0, 1, 1], [], []>} : vector<128x64xbf16>, vector<64x64xbf16>, vector<128x64xf32> -> vector<128x64xf32>
    %c0_3 = arith.constant 0 : index
    %c0_4 = arith.constant 0 : index
    %3 = vector.load %arg2[%c0_3, %c0_4] : memref<1x64xf32, #tpu.memory_space<vmem>>, vector<1x64xf32>
    %4 = vector.broadcast %3 : vector<1x64xf32> to vector<128x64xf32>
    %5 = arith.addf %2, %4 : vector<128x64xf32>
    %cst_5 = arith.constant 0.000000e+00 : f32
    %6 = vector.broadcast %cst_5 : f32 to vector<128x64xf32>
    %7 = arith.maximumf %5, %6 : vector<128x64xf32>
    %8 = arith.truncf %7 : vector<128x64xf32> to vector<128x64xbf16>
    %c0_6 = arith.constant 0 : index
    %c0_7 = arith.constant 0 : index
    %9 = vector.load %arg3[%c0_6, %c0_7] : memref<64x32xbf16, #tpu.memory_space<vmem>>, vector<64x32xbf16>
    %cst_8 = arith.constant dense<0.000000e+00> : vector<128x32xf32>
    %10 = tpu.matmul %8, %9, %cst_8 {dimension_numbers = #tpu.dot_dimension_numbers<[1], [0], [0], [1], [0, 0, 1, 1], [], []>} : vector<128x64xbf16>, vector<64x32xbf16>, vector<128x32xf32> -> vector<128x32xf32>
    %c0_9 = arith.constant 0 : index
    %c0_10 = arith.constant 0 : index
    %11 = vector.load %arg4[%c0_9, %c0_10] : memref<1x32xf32, #tpu.memory_space<vmem>>, vector<1x32xf32>
    %12 = vector.broadcast %11 : vector<1x32xf32> to vector<128x32xf32>
    %13 = arith.addf %10, %12 : vector<128x32xf32>
    %cst_11 = arith.constant 0.000000e+00 : f32
    %14 = vector.broadcast %cst_11 : f32 to vector<128x32xf32>
    %15 = arith.maximumf %13, %14 : vector<128x32xf32>
    %16 = vector.extract_strided_slice %15 {offsets = [0, 0], sizes = [8, 32], strides = [1, 1]} : vector<128x32xf32> to vector<8x32xf32>
    %c0_12 = arith.constant 0 : index
    %c0_13 = arith.constant 0 : index
    %17 = vector.load %arg13[%c0_12, %c0_13] : memref<8x512xf32, #tpu.memory_space<vmem>>, vector<8x32xf32>
    tpu.vector_store %arg13[%c0_12, %c0_13], %16 {strides = array<i32>} : memref<8x512xf32, #tpu.memory_space<vmem>>, vector<8x32xf32>,
    %18 = vector.extract_strided_slice %15 {offsets = [8, 0], sizes = [8, 32], strides = [1, 1]} : vector<128x32xf32> to vector<8x32xf32>
    %c0_14 = arith.constant 0 : index
    %c32 = arith.constant 32 : index
    %19 = vector.load %arg13[%c0_14, %c32] : memref<8x512xf32, #tpu.memory_space<vmem>>, vector<8x32xf32>
    tpu.vector_store %arg13[%c0_14, %c32], %18 {strides = array<i32>} : memref<8x512xf32, #tpu.memory_space<vmem>>, vector<8x32xf32>,
    %20 = vector.extract_strided_slice %15 {offsets = [16, 0], sizes = [8, 32], strides = [1, 1]} : vector<128x32xf32> to vector<8x32xf32>
    %c0_15 = arith.constant 0 : index
    %c64 = arith.constant 64 : index
    %21 = vector.load %arg13[%c0_15, %c64] : memref<8x512xf32, #tpu.memory_space<vmem>>, vector<8x32xf32>
    tpu.vector_store %arg13[%c0_15, %c64], %20 {strides = array<i32>} : memref<8x512xf32, #tpu.memory_space<vmem>>, vector<8x32xf32>,
    %22 = vector.extract_strided_slice %15 {offsets = [24, 0], sizes = [8, 32], strides = [1, 1]} : vector<128x32xf32> to vector<8x32xf32>
    %c0_16 = arith.constant 0 : index
    %c96 = arith.constant 96 : index
    %23 = vector.load %arg13[%c0_16, %c96] : memref<8x512xf32, #tpu.memory_space<vmem>>, vector<8x32xf32>
    tpu.vector_store %arg13[%c0_16, %c96], %22 {strides = array<i32>} : memref<8x512xf32, #tpu.memory_space<vmem>>, vector<8x32xf32>,
    %24 = vector.extract_strided_slice %15 {offsets = [32, 0], sizes = [8, 32], strides = [1, 1]} : vector<128x32xf32> to vector<8x32xf32>
    %c0_17 = arith.constant 0 : index
    %c128 = arith.constant 128 : index
    %25 = vector.load %arg13[%c0_17, %c128] : memref<8x512xf32, #tpu.memory_space<vmem>>, vector<8x32xf32>
    tpu.vector_store %arg13[%c0_17, %c128], %24 {strides = array<i32>} : memref<8x512xf32, #tpu.memory_space<vmem>>, vector<8x32xf32>,
    %26 = vector.extract_strided_slice %15 {offsets = [40, 0], sizes = [8, 32], strides = [1, 1]} : vector<128x32xf32> to vector<8x32xf32>
    %c0_18 = arith.constant 0 : index
    %c160 = arith.constant 160 : index
    %27 = vector.load %arg13[%c0_18, %c160] : memref<8x512xf32, #tpu.memory_space<vmem>>, vector<8x32xf32>
    tpu.vector_store %arg13[%c0_18, %c160], %26 {strides = array<i32>} : memref<8x512xf32, #tpu.memory_space<vmem>>, vector<8x32xf32>,
    %28 = vector.extract_strided_slice %15 {offsets = [48, 0], sizes = [8, 32], strides = [1, 1]} : vector<128x32xf32> to vector<8x32xf32>
    %c0_19 = arith.constant 0 : index
    %c192 = arith.constant 192 : index
    %29 = vector.load %arg13[%c0_19, %c192] : memref<8x512xf32, #tpu.memory_space<vmem>>, vector<8x32xf32>
    tpu.vector_store %arg13[%c0_19, %c192], %28 {strides = array<i32>} : memref<8x512xf32, #tpu.memory_space<vmem>>, vector<8x32xf32>,
    %30 = vector.extract_strided_slice %15 {offsets = [56, 0], sizes = [8, 32], strides = [1, 1]} : vector<128x32xf32> to vector<8x32xf32>
    %c0_20 = arith.constant 0 : index
    %c224 = arith.constant 224 : index
    %31 = vector.load %arg13[%c0_20, %c224] : memref<8x512xf32, #tpu.memory_space<vmem>>, vector<8x32xf32>
    tpu.vector_store %arg13[%c0_20, %c224], %30 {strides = array<i32>} : memref<8x512xf32, #tpu.memory_space<vmem>>, vector<8x32xf32>,
    %32 = vector.extract_strided_slice %15 {offsets = [64, 0], sizes = [8, 32], strides = [1, 1]} : vector<128x32xf32> to vector<8x32xf32>
    %c0_21 = arith.constant 0 : index
    %c256 = arith.constant 256 : index
    %33 = vector.load %arg13[%c0_21, %c256] : memref<8x512xf32, #tpu.memory_space<vmem>>, vector<8x32xf32>
    tpu.vector_store %arg13[%c0_21, %c256], %32 {strides = array<i32>} : memref<8x512xf32, #tpu.memory_space<vmem>>, vector<8x32xf32>,
    %34 = vector.extract_strided_slice %15 {offsets = [72, 0], sizes = [8, 32], strides = [1, 1]} : vector<128x32xf32> to vector<8x32xf32>
    %c0_22 = arith.constant 0 : index
    %c288 = arith.constant 288 : index
    %35 = vector.load %arg13[%c0_22, %c288] : memref<8x512xf32, #tpu.memory_space<vmem>>, vector<8x32xf32>
    tpu.vector_store %arg13[%c0_22, %c288], %34 {strides = array<i32>} : memref<8x512xf32, #tpu.memory_space<vmem>>, vector<8x32xf32>,
    %36 = vector.extract_strided_slice %15 {offsets = [80, 0], sizes = [8, 32], strides = [1, 1]} : vector<128x32xf32> to vector<8x32xf32>
    %c0_23 = arith.constant 0 : index
    %c320 = arith.constant 320 : index
    %37 = vector.load %arg13[%c0_23, %c320] : memref<8x512xf32, #tpu.memory_space<vmem>>, vector<8x32xf32>
    tpu.vector_store %arg13[%c0_23, %c320], %36 {strides = array<i32>} : memref<8x512xf32, #tpu.memory_space<vmem>>, vector<8x32xf32>,
    %38 = vector.extract_strided_slice %15 {offsets = [88, 0], sizes = [8, 32], strides = [1, 1]} : vector<128x32xf32> to vector<8x32xf32>
    %c0_24 = arith.constant 0 : index
    %c352 = arith.constant 352 : index
    %39 = vector.load %arg13[%c0_24, %c352] : memref<8x512xf32, #tpu.memory_space<vmem>>, vector<8x32xf32>
    tpu.vector_store %arg13[%c0_24, %c352], %38 {strides = array<i32>} : memref<8x512xf32, #tpu.memory_space<vmem>>, vector<8x32xf32>,
    %40 = vector.extract_strided_slice %15 {offsets = [96, 0], sizes = [8, 32], strides = [1, 1]} : vector<128x32xf32> to vector<8x32xf32>
    %c0_25 = arith.constant 0 : index
    %c384 = arith.constant 384 : index
    %41 = vector.load %arg13[%c0_25, %c384] : memref<8x512xf32, #tpu.memory_space<vmem>>, vector<8x32xf32>
    tpu.vector_store %arg13[%c0_25, %c384], %40 {strides = array<i32>} : memref<8x512xf32, #tpu.memory_space<vmem>>, vector<8x32xf32>,
    %42 = vector.extract_strided_slice %15 {offsets = [104, 0], sizes = [8, 32], strides = [1, 1]} : vector<128x32xf32> to vector<8x32xf32>
    %c0_26 = arith.constant 0 : index
    %c416 = arith.constant 416 : index
    %43 = vector.load %arg13[%c0_26, %c416] : memref<8x512xf32, #tpu.memory_space<vmem>>, vector<8x32xf32>
    tpu.vector_store %arg13[%c0_26, %c416], %42 {strides = array<i32>} : memref<8x512xf32, #tpu.memory_space<vmem>>, vector<8x32xf32>,
    %44 = vector.extract_strided_slice %15 {offsets = [112, 0], sizes = [8, 32], strides = [1, 1]} : vector<128x32xf32> to vector<8x32xf32>
    %c0_27 = arith.constant 0 : index
    %c448 = arith.constant 448 : index
    %45 = vector.load %arg13[%c0_27, %c448] : memref<8x512xf32, #tpu.memory_space<vmem>>, vector<8x32xf32>
    tpu.vector_store %arg13[%c0_27, %c448], %44 {strides = array<i32>} : memref<8x512xf32, #tpu.memory_space<vmem>>, vector<8x32xf32>,
    %46 = vector.extract_strided_slice %15 {offsets = [120, 0], sizes = [8, 32], strides = [1, 1]} : vector<128x32xf32> to vector<8x32xf32>
    %c0_28 = arith.constant 0 : index
    %c480 = arith.constant 480 : index
    %47 = vector.load %arg13[%c0_28, %c480] : memref<8x512xf32, #tpu.memory_space<vmem>>, vector<8x32xf32>
    tpu.vector_store %arg13[%c0_28, %c480], %46 {strides = array<i32>} : memref<8x512xf32, #tpu.memory_space<vmem>>, vector<8x32xf32>,
    %c0_29 = arith.constant 0 : index
    %c0_30 = arith.constant 0 : index
    %48 = vector.load %arg13[%c0_29, %c0_30] : memref<8x512xf32, #tpu.memory_space<vmem>>, vector<8x512xf32>
    %49 = arith.truncf %48 : vector<8x512xf32> to vector<8x512xbf16>
    %c0_31 = arith.constant 0 : index
    %c0_32 = arith.constant 0 : index
    %50 = vector.load %arg5[%c0_31, %c0_32] : memref<512x32xbf16, #tpu.memory_space<vmem>>, vector<512x32xbf16>
    %cst_33 = arith.constant dense<0.000000e+00> : vector<8x32xf32>
    %51 = tpu.matmul %49, %50, %cst_33 {dimension_numbers = #tpu.dot_dimension_numbers<[1], [0], [0], [1], [0, 0, 1, 1], [], []>} : vector<8x512xbf16>, vector<512x32xbf16>, vector<8x32xf32> -> vector<8x32xf32>
    %c0_34 = arith.constant 0 : index
    %c0_35 = arith.constant 0 : index
    %52 = vector.load %arg6[%c0_34, %c0_35] : memref<1x32xf32, #tpu.memory_space<vmem>>, vector<1x32xf32>
    %53 = vector.broadcast %52 : vector<1x32xf32> to vector<8x32xf32>
    %54 = arith.addf %51, %53 : vector<8x32xf32>
    %cst_36 = arith.constant 0.000000e+00 : f32
    %55 = vector.broadcast %cst_36 : f32 to vector<8x32xf32>
    %56 = arith.maximumf %54, %55 : vector<8x32xf32>
    %57 = arith.truncf %56 : vector<8x32xf32> to vector<8x32xbf16>
    %c0_37 = arith.constant 0 : index
    %c0_38 = arith.constant 0 : index
    %58 = vector.load %arg7[%c0_37, %c0_38] : memref<32x64xbf16, #tpu.memory_space<vmem>>, vector<32x64xbf16>
    %cst_39 = arith.constant dense<0.000000e+00> : vector<8x64xf32>
    %59 = tpu.matmul %57, %58, %cst_39 {dimension_numbers = #tpu.dot_dimension_numbers<[1], [0], [0], [1], [0, 0, 1, 1], [], []>} : vector<8x32xbf16>, vector<32x64xbf16>, vector<8x64xf32> -> vector<8x64xf32>
    %c0_40 = arith.constant 0 : index
    %c0_41 = arith.constant 0 : index
    %60 = vector.load %arg8[%c0_40, %c0_41] : memref<1x64xf32, #tpu.memory_space<vmem>>, vector<1x64xf32>
    %61 = vector.broadcast %60 : vector<1x64xf32> to vector<8x64xf32>
    %62 = arith.addf %59, %61 : vector<8x64xf32>
    %cst_42 = arith.constant 0.000000e+00 : f32
    %63 = vector.broadcast %cst_42 : f32 to vector<8x64xf32>
    %64 = arith.maximumf %62, %63 : vector<8x64xf32>
    %65 = arith.truncf %64 : vector<8x64xf32> to vector<8x64xbf16>
    %c0_43 = arith.constant 0 : index
    %c0_44 = arith.constant 0 : index
    %66 = vector.load %arg9[%c0_43, %c0_44] : memref<64x128xbf16, #tpu.memory_space<vmem>>, vector<64x128xbf16>
    %cst_45 = arith.constant dense<0.000000e+00> : vector<8x128xf32>
    %67 = tpu.matmul %65, %66, %cst_45 {dimension_numbers = #tpu.dot_dimension_numbers<[1], [0], [0], [1], [0, 0, 1, 1], [], []>} : vector<8x64xbf16>, vector<64x128xbf16>, vector<8x128xf32> -> vector<8x128xf32>
    %c0_46 = arith.constant 0 : index
    %c0_47 = arith.constant 0 : index
    %68 = vector.load %arg10[%c0_46, %c0_47] : memref<1x128xf32, #tpu.memory_space<vmem>>, vector<1x128xf32>
    %69 = vector.broadcast %68 : vector<1x128xf32> to vector<8x128xf32>
    %70 = arith.addf %67, %69 : vector<8x128xf32>
    %71 = tpu.iota {dimensions = array<i32: 1>} : vector<8x128xi32>
    %c10_i32 = arith.constant 10 : i32
    %72 = vector.broadcast %c10_i32 : i32 to vector<8x128xi32>
    %73 = arith.cmpi slt, %71, %72 : vector<8x128xi32>
    %cst_48 = arith.constant -1.000000e+30 : f32
    %74 = vector.broadcast %cst_48 : f32 to vector<8x128xf32>
    %75 = arith.select %73, %70, %74 : vector<8x128xi1>, vector<8x128xf32>
    %cst_49 = arith.constant dense<0xFF800000> : vector<8xf32>
    %76 = vector.multi_reduction <maximumf>, %75, %cst_49 [1] : vector<8x128xf32> to vector<8xf32>
    %77 = vector.shape_cast %76 : vector<8xf32> to vector<8x1xf32>
    %78 = vector.broadcast %77 : vector<8x1xf32> to vector<8x128xf32>
    %79 = arith.subf %75, %78 : vector<8x128xf32>
    %80 = math.exp %79 : vector<8x128xf32>
    %cst_50 = arith.constant 0.000000e+00 : f32
    %81 = vector.broadcast %cst_50 : f32 to vector<8x128xf32>
    %82 = arith.select %73, %80, %81 : vector<8x128xi1>, vector<8x128xf32>
    %cst_51 = arith.constant dense<0.000000e+00> : vector<8xf32>
    %83 = vector.multi_reduction <add>, %82, %cst_51 [1] : vector<8x128xf32> to vector<8xf32>
    %84 = vector.shape_cast %83 : vector<8xf32> to vector<8x1xf32>
    %85 = tpu.reciprocal %84 {approx = true} : vector<8x1xf32> -> vector<8x1xf32>
    %86 = vector.broadcast %85 : vector<8x1xf32> to vector<8x128xf32>
    %87 = arith.mulf %82, %86 : vector<8x128xf32>
    %c0_52 = arith.constant 0 : index
    %c0_53 = arith.constant 0 : index
    %88 = vector.load %arg11[%c0_52, %c0_53] : memref<8x128xf32, #tpu.memory_space<vmem>>, vector<8x128xf32>
    tpu.vector_store %arg11[%c0_52, %c0_53], %87 {strides = array<i32>} : memref<8x128xf32, #tpu.memory_space<vmem>>, vector<8x128xf32>,
    %89 = math.log %84 : vector<8x1xf32>
    %90 = vector.broadcast %89 : vector<8x1xf32> to vector<8x128xf32>
    %91 = arith.subf %79, %90 : vector<8x128xf32>
    %c0_54 = arith.constant 0 : index
    %c0_55 = arith.constant 0 : index
    %92 = vector.load %arg12[%c0_54, %c0_55] : memref<8x128xf32, #tpu.memory_space<vmem>>, vector<8x128xf32>
    tpu.vector_store %arg12[%c0_54, %c0_55], %91 {strides = array<i32>} : memref<8x128xf32, #tpu.memory_space<vmem>>, vector<8x128xf32>,
    return
  }
}

</mosaic_0001>

<bundles_post_ra>
// kernel: _lambda_.1
= control target key start
LH: loop header
LB: loop body
LE: loop exit
PB: predicated region body
PF: predicated region fallthrough
CT: control target
= control target key end

     0   :  { %vm133_vm0 = vcmask 523264   ;;  %vm356_vm1 = vcmask 261120   ;;  %s1167_s17 = smov 96   ;;  %vm362_vm2 = vcmask 523520   ;;  %vm368_vm3 = vcmask 785920   ;;  %s1480_s1 = inlined_call_operand.vmem [shape: bf16[64,64], index: 1, kind: input, shape index: {}]   ;;  %s1481_s2 = inlined_call_operand.vmem [shape: f32[1,64], index: 2, kind: input, shape index: {}]   ;;  %s1482_s0 = inlined_call_operand.vmem [shape: bf16[128,64], index: 0, kind: input, shape index: {}]   ;;  %s1483_s3 = inlined_call_operand.vmem [shape: bf16[64,32], index: 3, kind: input, shape index: {}]   ;;  %s1484_s4 = inlined_call_operand.vmem [shape: f32[1,32], index: 4, kind: input, shape index: {}]   ;;  %s1485_s5 = inlined_call_operand.vmem [shape: bf16[512,32], index: 5, kind: input, shape index: {}]   ;;  %s1486_s6 = inlined_call_operand.vmem [shape: f32[1,32], index: 6, kind: input, shape index: {}]   ;;  %s1487_s8 = inlined_call_operand.vmem [shape: f32[1,64], index: 8, kind: input, shape index: {}]   ;;  %s1488_s7 = inlined_call_operand.vmem [shape: bf16[32,64], index: 7, kind: input, shape index: {}]   ;;  %s1489_s9 = inlined_call_operand.vmem [shape: bf16[64,128], index: 9, kind: input, shape index: {}]   ;;  %s1490_s10 = inlined_call_operand.vmem [shape: f32[1,128], index: 10, kind: input, shape index: {}]   ;;  %s1491_s11 = inlined_call_operand.vmem [shape: f32[8,128], index: 11, kind: output, shape index: {0}]   ;;  %s1492_s12 = inlined_call_operand.vmem [shape: f32[8,128], index: 12, kind: output, shape index: {1}]  }
   0x1   :  { %v1108_v0 = vld [vmem:[%s1480_s1 + $0x18] sm:$0xff]  ;;  %v1107_v1 = vld [vmem:[%s1480_s1 + $0x10] sm:$0xff]  ;;  %v1106_v2 = vld [vmem:[%s1480_s1 + $0x8] sm:$0xff]  ;;  %vm374_vm4 = vcmask 1048320  }
   0x2   :  { %162 = vmatpush.bf16.msra.mxu0 %v1108_v0  ;;  %v1105_v3 = vld [vmem:[%s1480_s1] sm:$0xff]  ;;  %v1098_v5 = vld [vmem:[%s1482_s0 + $0x8] sm:$0xff]  ;;  %v1099_v6 = vld [vmem:[%s1482_s0 + $0x10] sm:$0xff] }
   0x3   :  { %v1097_v4 = vld [vmem:[%s1482_s0] sm:$0xff]  ;;  %v1100_v7 = vld [vmem:[%s1482_s0 + $0x18] sm:$0xff]  ;;  %v1102_v9 = vld [vmem:[%s1482_s0 + $0x28] sm:$0xff] }
   0x4   :  { %v1101_v8 = vld [vmem:[%s1482_s0 + $0x20] sm:$0xff]  ;;  %v1112_v10 = vld [vmem:[%s1483_s3 + $0x18] sm:$0xff]  ;;  %v1103_v11 = vld [vmem:[%s1482_s0 + $0x30] sm:$0xff] }
   0x5   :  { %295 = vmatpush.bf16.msra.mxu1 %v1112_v10  ;;  %v1111_v12 = vld [vmem:[%s1483_s3 + $0x10] sm:$0xff]  ;;  %v1110_v13 = vld [vmem:[%s1483_s3 + $0x8] sm:$0xff]  ;;  %v1109_v14 = vld [vmem:[%s1483_s3] sm:$0xff]  ;;  %s1165_s3 = smov 32  }
   0x6   :  { %163 = vmatpush.bf16.msra.mxu0 %v1107_v1  ;;  %v1104_v15 = vld [vmem:[%s1482_s0 + $0x38] sm:$0xff]  ;;  %v1154_v17 = vld [vmem:[%s1481_s2] ss:$0 sm:$0xff] }
   0x9   :  { %296 = vmatpush.bf16.msra.mxu1 %v1111_v12 }
   0xa   :  { %164 = vmatpush.bf16.msra.mxu0 %v1106_v2 }
   0xd   :  { %297 = vmatpush.bf16.msra.mxu1 %v1110_v13 }
   0xe   :  { %165 = vmatpush.bf16.msra.mxu0 %v1105_v3 }
  0x11   :  { %911 = vmatmul.msk.bf16.vlgmr.msra.gmra.mxu0 %vm133_vm0, %v1097_v4  ;;  %298 = vmatpush.bf16.msra.mxu1 %v1109_v14 }
  0x21   :  { %912 = vmatmul.msk.bf16.gmra.mxu0 %vm133_vm0, %v1098_v5 }
  0x31   :  { %913 = vmatmul.msk.bf16.gmra.mxu0 %vm133_vm0, %v1099_v6 }
  0x41   :  { %914 = vmatmul.msk.bf16.gmra.mxu0 %vm133_vm0, %v1100_v7 }
  0x51   :  { %915 = vmatmul.msk.bf16.gmra.mxu0 %vm133_vm0, %v1101_v8 }
  0x61   :  { %916 = vmatmul.msk.bf16.gmra.mxu0 %vm133_vm0, %v1102_v9  ;;  %v1303_v9 = vld [vmem:[%s1484_s4] ss:$0 sm:$0xff]  ;;  %s1166_s4 = smov 64  }
  0x71   :  { %917 = vmatmul.msk.bf16.gmra.mxu0 %vm133_vm0, %v1103_v11 }
  0x81   :  { %918 = vmatmul.msk.bf16.gmra.mxu0 %vm133_vm0, %v1104_v15 }
  0x8e   :  { %v167_v16 = vpop.f32.mrf.mxu0 }
  0x8f   :  { %v168_v18 = vadd.f32 %v1154_v17, %v167_v16 }
  0x91   :  { %v207_v21 = vmax.f32 %v168_v18, 0.0 }
  0x96   :  { %v169_v19 = vpop.f32.mrf.mxu0 }
  0x97   :  { %v170_v20 = vadd.f32 %v1154_v17, %v169_v19 }
  0x99   :  { %v208_v22 = vmax.f32 %v170_v20, 0.0 }
  0x9b   :  { %v223_v23 = vpack.c.bf16 %v208_v22, %v207_v21 }
  0x9d   :  { %935 = vmatmul.msk.bf16.vlgmr.msra.gmra.mxu1 %vm133_vm0, %v223_v23 }
  0x9e   :  { %v172_v24 = vpop.f32.mrf.mxu0 }
  0x9f   :  { %v173_v25 = vadd.f32 %v1154_v17, %v172_v24 }
  0xa1   :  { %v209_v28 = vmax.f32 %v173_v25, 0.0 }
  0xa6   :  { %v174_v26 = vpop.f32.mrf.mxu0 }
  0xa7   :  { %v175_v27 = vadd.f32 %v1154_v17, %v174_v26 }
  0xa9   :  { %v210_v29 = vmax.f32 %v175_v27, 0.0 }
  0xab   :  { %v224_v30 = vpack.c.bf16 %v210_v29, %v209_v28 }
  0xad   :  { %936 = vmatmul.msk.bf16.gmra.mxu1 %vm133_vm0, %v224_v30 }
  0xae   :  { %v177_v31 = vpop.f32.mrf.mxu0 }
  0xaf   :  { %v178_v32 = vadd.f32 %v1154_v17, %v177_v31 }
  0xb1   :  { %v211_v35 = vmax.f32 %v178_v32, 0.0 }
  0xb6   :  { %v179_v33 = vpop.f32.mrf.mxu0 }
  0xb7   :  { %v180_v34 = vadd.f32 %v1154_v17, %v179_v33 }
  0xb9   :  { %v212_v36 = vmax.f32 %v180_v34, 0.0 }
  0xbb   :  { %v225_v37 = vpack.c.bf16 %v212_v36, %v211_v35 }
  0xbd   :  { %937 = vmatmul.msk.bf16.gmra.mxu1 %vm133_vm0, %v225_v37 }
  0xbe   :  { %v182_v38 = vpop.f32.mrf.mxu0 }
  0xbf   :  { %v183_v39 = vadd.f32 %v1154_v17, %v182_v38 }
  0xc1   :  { %v213_v42 = vmax.f32 %v183_v39, 0.0 }
  0xc6   :  { %v184_v40 = vpop.f32.mrf.mxu0 }
  0xc7   :  { %v185_v41 = vadd.f32 %v1154_v17, %v184_v40 }
  0xc9   :  { %v214_v43 = vmax.f32 %v185_v41, 0.0 }
  0xcb   :  { %v226_v44 = vpack.c.bf16 %v214_v43, %v213_v42 }
  0xcd   :  { %938 = vmatmul.msk.bf16.gmra.mxu1 %vm133_vm0, %v226_v44 }
  0xce   :  { %v187_v45 = vpop.f32.mrf.mxu0 }
  0xcf   :  { %v188_v46 = vadd.f32 %v1154_v17, %v187_v45  ;;  %v1120_v45 = vld [vmem:[%s1485_s5 + $0x38] sm:$0xff] }
  0xd0   :  { %692 = vmatpush.bf16.msra.mxu2 %v1120_v45 }
  0xd1   :  { %v215_v49 = vmax.f32 %v188_v46, 0.0 }
  0xd6   :  { %v189_v47 = vpop.f32.mrf.mxu0 }
  0xd7   :  { %v190_v48 = vadd.f32 %v1154_v17, %v189_v47  ;;  %v1119_v47 = vld [vmem:[%s1485_s5 + $0x30] sm:$0xff] }
  0xd8   :  { %693 = vmatpush.bf16.msra.mxu2 %v1119_v47 }
  0xd9   :  { %v216_v50 = vmax.f32 %v190_v48, 0.0 }
  0xdb   :  { %v227_v51 = vpack.c.bf16 %v216_v50, %v215_v49  ;;  %v1118_v49 = vld [vmem:[%s1485_s5 + $0x28] sm:$0xff] }
  0xdc   :  { %694 = vmatpush.bf16.msra.mxu2 %v1118_v49 }
  0xdd   :  { %939 = vmatmul.msk.bf16.gmra.mxu1 %vm133_vm0, %v227_v51 }
  0xde   :  { %v192_v52 = vpop.f32.mrf.mxu0 }
  0xdf   :  { %v193_v53 = vadd.f32 %v1154_v17, %v192_v52  ;;  %v1117_v52 = vld [vmem:[%s1485_s5 + $0x20] sm:$0xff] }
  0xe0   :  { %695 = vmatpush.bf16.msra.mxu2 %v1117_v52 }
  0xe1   :  { %v217_v56 = vmax.f32 %v193_v53, 0.0 }
  0xe6   :  { %v194_v54 = vpop.f32.mrf.mxu0 }
  0xe7   :  { %v195_v55 = vadd.f32 %v1154_v17, %v194_v54  ;;  %v1116_v54 = vld [vmem:[%s1485_s5 + $0x18] sm:$0xff] }
  0xe8   :  { %696 = vmatpush.bf16.msra.mxu2 %v1116_v54  ;;  %v1145_v54 = vld [vmem:[%s1488_s7] sm:$0xff] }
  0xe9   :  { %v218_v57 = vmax.f32 %v195_v55, 0.0  ;;  %v1128_v55 = vld [vmem:[%s1485_s5 + $0x78] sm:$0xff] }
  0xea   :  { %705 = vmatpush.bf16.msra.mxu3 %v1128_v55 }
  0xeb   :  { %v228_v58 = vpack.c.bf16 %v218_v57, %v217_v56 }
  0xed   :  { %940 = vmatmul.msk.bf16.gmra.mxu1 %vm133_vm0, %v228_v58  ;;  %v1115_v58 = vld [vmem:[%s1485_s5 + $0x10] sm:$0xff] }
  0xee   :  { %v197_v59 = vpop.f32.mrf.mxu0  ;;  %697 = vmatpush.bf16.msra.mxu2 %v1115_v58  ;;  %v1149_v58 = vld [vmem:[%s1489_s9 + $0x10] sm:$0xff] }
  0xef   :  { %v198_v60 = vadd.f32 %v1154_v17, %v197_v59  ;;  %v1127_v59 = vld [vmem:[%s1485_s5 + $0x70] sm:$0xff] }
  0xf0   :  { %706 = vmatpush.bf16.msra.mxu3 %v1127_v59  ;;  %v1148_v59 = vld [vmem:[%s1489_s9 + $0x8] sm:$0xff] }
  0xf1   :  { %v219_v63 = vmax.f32 %v198_v60, 0.0 }
  0xf6   :  { %v199_v61 = vpop.f32.mrf.mxu0 }
  0xf7   :  { %v200_v62 = vadd.f32 %v1154_v17, %v199_v61  ;;  %v1114_v61 = vld [vmem:[%s1485_s5 + $0x8] sm:$0xff] }
  0xf8   :  { %698 = vmatpush.bf16.msra.mxu2 %v1114_v61 }
  0xf9   :  { %v220_v0 = vmax.f32 %v200_v62, 0.0 }
  0xfb   :  { %v229_v1 = vpack.c.bf16 %v220_v0, %v219_v63  ;;  %v1126_v63 = vld [vmem:[%s1485_s5 + $0x68] sm:$0xff] }
  0xfc   :  { %707 = vmatpush.bf16.msra.mxu3 %v1126_v63 }
  0xfd   :  { %941 = vmatmul.msk.bf16.gmra.mxu1 %vm133_vm0, %v229_v1  ;;  %v1113_v1 = vld [vmem:[%s1485_s5] sm:$0xff] }
  0xfe   :  { %v202_v2 = vpop.f32.mrf.mxu0  ;;  %699 = vmatpush.bf16.msra.mxu2 %v1113_v1 }
  0xff   :  { %v203_v3 = vadd.f32 %v1154_v17, %v202_v2  ;;  %v1125_v2 = vld [vmem:[%s1485_s5 + $0x60] sm:$0xff] }
 0x100   :  { %708 = vmatpush.bf16.msra.mxu3 %v1125_v2  ;;  %v1147_v2 = vld [vmem:[%s1489_s9] sm:$0xff] }
 0x101   :  { %v221_v6 = vmax.f32 %v203_v3, 0.0 }
 0x106   :  { %v204_v4 = vpop.f32.mrf.mxu0 }
 0x107   :  { %v205_v5 = vadd.f32 %v1154_v17, %v204_v4 }
 0x109   :  { %v222_v7 = vmax.f32 %v205_v5, 0.0  ;;  %v1124_v5 = vld [vmem:[%s1485_s5 + $0x58] sm:$0xff] }
 0x10a   :  { %709 = vmatpush.bf16.msra.mxu3 %v1124_v5 }
 0x10b   :  { %v230_v8 = vpack.c.bf16 %v222_v7, %v221_v6 }
 0x10d   :  { %942 = vmatmul.msk.bf16.gmra.mxu1 %vm133_vm0, %v230_v8  ;;  %v1123_v8 = vld [vmem:[%s1485_s5 + $0x50] sm:$0xff] }
 0x10e   :  { %710 = vmatpush.bf16.msra.mxu3 %v1123_v8 }
 0x11a   :  { %v300_v10 = vpop.f32.mrf.mxu1 }
 0x11b   :  { %v301_v11 = vadd.f32 %v1303_v9, %v300_v10  ;;  %v1121_v10 = vld [vmem:[%s1485_s5 + $0x40] sm:$0xff] }
 0x11d   :  { %v340_v12 = vmax.f32 %v301_v11, 0.0 }
 0x11f   :  { %357 = vst.msk [vmem:[#allocation2] sm:$0xff] %vm356_vm1, %v340_v12  ;;  %v1136_v12 = vld [vmem:[%s1485_s5 + $0xb8] sm:$0xff] }
 0x120   :  { %718 = vmatpush.bf16.msrb.mxu2 %v1136_v12 }
 0x122   :  { %v302_v13 = vpop.f32.mrf.mxu1 }
 0x123   :  { %v303_v14 = vadd.f32 %v1303_v9, %v302_v13 }
 0x125   :  { %v341_v15 = vmax.f32 %v303_v14, 0.0  ;;  %v1135_v14 = vld [vmem:[%s1485_s5 + $0xb0] sm:$0xff] }
 0x126   :  { %719 = vmatpush.bf16.msrb.mxu2 %v1135_v14 }
 0x127   :  { %359 = vrot.lane.b32.xlu0 %v341_v15, %s1165_s3 }
 0x12a   :  { %v305_v16 = vpop.f32.mrf.mxu1 }
 0x12b   :  { %v306_v17 = vadd.f32 %v1303_v9, %v305_v16 }
 0x12d   :  { %v342_v18 = vmax.f32 %v306_v17, 0.0 }
 0x12f   :  { %365 = vrot.lane.b32.xlu0 %v342_v18, %s1166_s4  ;;  %v1134_v18 = vld [vmem:[%s1485_s5 + $0xa8] sm:$0xff] }
 0x130   :  { %720 = vmatpush.bf16.msrb.mxu2 %v1134_v18 }
 0x132   :  { %v307_v19 = vpop.f32.mrf.mxu1 }
 0x133   :  { %v308_v20 = vadd.f32 %v1303_v9, %v307_v19  ;;  %v1133_v19 = vld [vmem:[%s1485_s5 + $0xa0] sm:$0xff] }
 0x134   :  { %721 = vmatpush.bf16.msrb.mxu2 %v1133_v19 }
 0x135   :  { %v343_v21 = vmax.f32 %v308_v20, 0.0 }
 0x137   :  { %371 = vrot.lane.b32.xlu1 %v343_v21, %s1167_s17  ;;  %v1132_v21 = vld [vmem:[%s1485_s5 + $0x98] sm:$0xff] }
 0x138   :  { %722 = vmatpush.bf16.msrb.mxu2 %v1132_v21 }
 0x13a   :  { %v310_v22 = vpop.f32.mrf.mxu1 }
 0x13b   :  { %v311_v23 = vadd.f32 %v1303_v9, %v310_v22 }
 0x13d   :  { %v344_v24 = vmax.f32 %v311_v23, 0.0  ;;  %v1131_v23 = vld [vmem:[%s1485_s5 + $0x90] sm:$0xff] }
 0x13e   :  { %723 = vmatpush.bf16.msrb.mxu2 %v1131_v23 }
 0x13f   :  { %376 = vst.msk [vmem:[#allocation2 + $0x8] sm:$0xff] %vm356_vm1, %v344_v24 }
 0x142   :  { %v312_v25 = vpop.f32.mrf.mxu1 }
 0x143   :  { %v313_v26 = vadd.f32 %v1303_v9, %v312_v25  ;;  %v1130_v25 = vld [vmem:[%s1485_s5 + $0x88] sm:$0xff] }
 0x144   :  { %724 = vmatpush.bf16.msrb.mxu2 %v1130_v25 }
 0x145   :  { %v345_v27 = vmax.f32 %v313_v26, 0.0 }
 0x147   :  { %378 = vrot.lane.b32.xlu1 %v345_v27, %s1165_s3  ;;  %v1129_v27 = vld [vmem:[%s1485_s5 + $0x80] sm:$0xff] }
 0x148   :  { %725 = vmatpush.bf16.msrb.mxu2 %v1129_v27 }
 0x14a   :  { %v315_v28 = vpop.f32.mrf.mxu1 }
 0x14b   :  { %v316_v29 = vadd.f32 %v1303_v9, %v315_v28  ;;  %v1144_v28 = vld [vmem:[%s1485_s5 + $0xf8] sm:$0xff] }
 0x14d   :  { %v346_v30 = vmax.f32 %v316_v29, 0.0  ;;  %v1143_v29 = vld [vmem:[%s1485_s5 + $0xf0] sm:$0xff] }
 0x14f   :  { %383 = vrot.lane.b32.xlu2 %v346_v30, %s1166_s4  ;;  %v1142_v30 = vld [vmem:[%s1485_s5 + $0xe8] sm:$0xff] }
 0x152   :  { %v317_v31 = vpop.f32.mrf.mxu1 }
 0x153   :  { %v318_v32 = vadd.f32 %v1303_v9, %v317_v31  ;;  %v1141_v31 = vld [vmem:[%s1485_s5 + $0xe0] sm:$0xff] }
 0x155   :  { %v347_v33 = vmax.f32 %v318_v32, 0.0 }
 0x157   :  { %388 = vrot.lane.b32.xlu2 %v347_v33, %s1167_s17  ;;  %v1140_v33 = vld [vmem:[%s1485_s5 + $0xd8] sm:$0xff] }
 0x15a   :  { %v320_v34 = vpop.f32.mrf.mxu1 }
 0x15b   :  { %v321_v35 = vadd.f32 %v1303_v9, %v320_v34  ;;  %v1139_v34 = vld [vmem:[%s1485_s5 + $0xd0] sm:$0xff] }
 0x15d   :  { %v348_v36 = vmax.f32 %v321_v35, 0.0 }
 0x15f   :  { %392 = vst.msk [vmem:[#allocation2 + $0x10] sm:$0xff] %vm356_vm1, %v348_v36 }
 0x162   :  { %v322_v37 = vpop.f32.mrf.mxu1 }
 0x163   :  { %v323_v38 = vadd.f32 %v1303_v9, %v322_v37  ;;  %v1138_v37 = vld [vmem:[%s1485_s5 + $0xc8] sm:$0xff] }
 0x165   :  { %v349_v39 = vmax.f32 %v323_v38, 0.0  ;;  %v1137_v38 = vld [vmem:[%s1485_s5 + $0xc0] sm:$0xff] }
 0x167   :  { %394 = vrot.lane.b32.xlu0 %v349_v39, %s1165_s3 }
 0x16a   :  { %v325_v40 = vpop.f32.mrf.mxu1 }
 0x16b   :  { %v326_v41 = vadd.f32 %v1303_v9, %v325_v40 }
 0x16d   :  { %v350_v42 = vmax.f32 %v326_v41, 0.0 }
 0x16f   :  { %399 = vrot.lane.b32.xlu1 %v350_v42, %s1166_s4 }
 0x172   :  { %v327_v43 = vpop.f32.mrf.mxu1 }
 0x173   :  { %v328_v44 = vadd.f32 %v1303_v9, %v327_v43 }
 0x175   :  { %v351_v46 = vmax.f32 %v328_v44, 0.0 }
 0x177   :  { %404 = vrot.lane.b32.xlu2 %v351_v46, %s1167_s17 }
 0x17a   :  { %v330_v48 = vpop.f32.mrf.mxu1 }
 0x17b   :  { %v331_v50 = vadd.f32 %v1303_v9, %v330_v48  ;;  %v1156_v48 = vld [vmem:[%s1486_s6] ss:$0 sm:$0xff] }
 0x17d   :  { %v352_v51 = vmax.f32 %v331_v50, 0.0 }
 0x17f   :  { %408 = vst.msk [vmem:[#allocation2 + $0x18] sm:$0xff] %vm356_vm1, %v352_v51 }
 0x182   :  { %v332_v53 = vpop.f32.mrf.mxu1 }
 0x183   :  { %v333_v56 = vadd.f32 %v1303_v9, %v332_v53  ;;  %v1146_v53 = vld [vmem:[%s1488_s7 + $0x8] sm:$0xff] }
 0x185   :  { %v353_v57 = vmax.f32 %v333_v56, 0.0 }
 0x187   :  { %410 = vrot.lane.b32.xlu0 %v353_v57, %s1165_s3  ;;  %v1150_v57 = vld [vmem:[%s1489_s9 + $0x18] sm:$0xff] }
 0x18a   :  { %v335_v60 = vpop.f32.mrf.mxu1 }
 0x18b   :  { %v336_v62 = vadd.f32 %v1303_v9, %v335_v60 }
 0x18d   :  { %v354_v0 = vmax.f32 %v336_v62, 0.0 }
 0x18f   :  { %415 = vrot.lane.b32.xlu1 %v354_v0, %s1166_s4 }
 0x192   :  { %v337_v3 = vpop.f32.mrf.mxu1 }
 0x193   :  { %v338_v4 = vadd.f32 %v1303_v9, %v337_v3  ;;  %v1122_v9 = vld [vmem:[%s1485_s5 + $0x48] sm:$0xff]  ;;  %v1157_v3 = vld [vmem:[%s1487_s8] ss:$0 sm:$0xff] }
 0x194   :  { %711 = vmatpush.bf16.msra.mxu3 %v1122_v9  ;;  %v836_v9 = vlaneseq }
 0x195   :  { %v355_v6 = vmax.f32 %v338_v4, 0.0 }
 0x197   :  { %420 = vrot.lane.b32.xlu2 %v355_v6, %s1167_s17 }
 0x198   :  { %712 = vmatpush.bf16.msra.mxu3 %v1121_v10  ;;  %v837_v10 = vand.u32 127, %v836_v9 }
 0x199   :  { %v360_v7 = vpop.permute.xlu0 %359 }
 0x19a   :  { %363 = vst.msk [vmem:[#allocation2] sm:$0xff] %vm362_vm2, %v360_v7  ;;  %vm838_vm5 = vcmp.lt.s32.totalorder %v837_v10, 10 }
 0x19c   :  { %731 = vmatpush.bf16.msrb.mxu3 %v1144_v28 }
 0x1a0   :  { %732 = vmatpush.bf16.msrb.mxu3 %v1143_v29 }
 0x1a1   :  { %v366_v11 = vpop.permute.xlu0 %365 }
 0x1a2   :  { %369 = vst.msk [vmem:[#allocation2] sm:$0xff] %vm368_vm3, %v366_v11  ;;  %v1158_v11 = vld [vmem:[%s1490_s10] ss:$0 sm:$0xff] }
 0x1a4   :  { %733 = vmatpush.bf16.msrb.mxu3 %v1142_v30 }
 0x1a8   :  { %734 = vmatpush.bf16.msrb.mxu3 %v1141_v31 }
 0x1a9   :  { %v372_v13 = vpop.permute.xlu1 %371  ;;  %v384_v15 = vpop.permute.xlu2 %383 }
 0x1aa   :  { %375 = vst.msk [vmem:[#allocation2] sm:$0xff] %vm374_vm4, %v372_v13 }
 0x1ac   :  { %735 = vmatpush.bf16.msrb.mxu3 %v1140_v33 }
 0x1b0   :  { %736 = vmatpush.bf16.msrb.mxu3 %v1139_v34 }
 0x1b1   :  { %v424_v16 = vld [vmem:[#allocation2] sm:$0xff]  ;;  %v389_v22 = vpop.permute.xlu2 %388 }
 0x1b2   :  { %v428_v17 = vpack.c.bf16 %v424_v16, %v424_v16 }
 0x1b4   :  { %700 = vmatmul.bf16.vlgmr.msra.gmra.mxu2 %v428_v17  ;;  %737 = vmatpush.bf16.msrb.mxu3 %v1138_v37 }
 0x1b5   :  { %775 = vmatpush.bf16.msra.mxu2 %v1146_v53 }
 0x1b8   :  { %738 = vmatpush.bf16.msrb.mxu3 %v1137_v38 }
 0x1b9   :  { %v379_v20 = vpop.permute.xlu1 %378  ;;  %776 = vmatpush.bf16.msra.mxu2 %v1145_v54 }
 0x1ba   :  { %381 = vst.msk [vmem:[#allocation2 + $0x8] sm:$0xff] %vm362_vm2, %v379_v20 }
 0x1bb   :  { %386 = vst.msk [vmem:[#allocation2 + $0x8] sm:$0xff] %vm368_vm3, %v384_v15 }
 0x1bc   :  { %391 = vst.msk [vmem:[#allocation2 + $0x8] sm:$0xff] %vm374_vm4, %v389_v22 }
 0x1c3   :  { %v425_v24 = vld [vmem:[#allocation2 + $0x8] sm:$0xff] }
 0x1c4   :  { %v429_v26 = vpack.c.bf16 %v425_v24, %v425_v24 }
 0x1c6   :  { %713 = vmatmul.bf16.vlgmr.msra.gmra.mxu3 %v429_v26 }
 0x1c7   :  { %827 = vmatpush.bf16.msra.mxu3 %v1150_v57 }
 0x1cb   :  { %828 = vmatpush.bf16.msra.mxu3 %v1149_v58 }
 0x1cf   :  { %829 = vmatpush.bf16.msra.mxu3 %v1148_v59 }
 0x1d1   :  { %v405_v36 = vpop.permute.xlu2 %404 }
 0x1d3   :  { %830 = vmatpush.bf16.msra.mxu3 %v1147_v2 }
 0x1d9   :  { %v395_v32 = vpop.permute.xlu0 %394 }
 0x1da   :  { %397 = vst.msk [vmem:[#allocation2 + $0x10] sm:$0xff] %vm362_vm2, %v395_v32 }
 0x1e1   :  { %v400_v35 = vpop.permute.xlu1 %399 }
 0x1e2   :  { %402 = vst.msk [vmem:[#allocation2 + $0x10] sm:$0xff] %vm368_vm3, %v400_v35 }
 0x1e3   :  { %407 = vst.msk [vmem:[#allocation2 + $0x10] sm:$0xff] %vm374_vm4, %v405_v36 }
 0x1ea   :  { %v426_v39 = vld [vmem:[#allocation2 + $0x10] sm:$0xff] }
 0x1eb   :  { %v430_v40 = vpack.c.bf16 %v426_v39, %v426_v39 }
 0x1ed   :  { %726 = vmatmul.bf16.vlgmr.msrb.gmra.mxu2 %v430_v40 }
 0x1f1   :  { %v421_v43 = vpop.permute.xlu2 %420 }
 0x1f9   :  { %v411_v41 = vpop.permute.xlu0 %410 }
 0x1fa   :  { %413 = vst.msk [vmem:[#allocation2 + $0x18] sm:$0xff] %vm362_vm2, %v411_v41 }
 0x201   :  { %v416_v42 = vpop.permute.xlu1 %415 }
 0x202   :  { %418 = vst.msk [vmem:[#allocation2 + $0x18] sm:$0xff] %vm368_vm3, %v416_v42 }
 0x203   :  { %423 = vst.msk [vmem:[#allocation2 + $0x18] sm:$0xff] %vm374_vm4, %v421_v43 }
 0x20a   :  { %v427_v44 = vld [vmem:[#allocation2 + $0x18] sm:$0xff] }
 0x20b   :  { %v431_v45 = vpack.c.bf16 %v427_v44, %v427_v44 }
 0x20d   :  { %739 = vmatmul.bf16.vlgmr.msrb.gmra.mxu3 %v431_v45 }
 0x237   :  { %v701_v46 = vpop.f32.mrf.mxu2 }
 0x238   :  { %v702_v49 = vadd.f32 %v1156_v48, %v701_v46 }
 0x23f   :  { %v703_v47 = vpop.f32.mrf.mxu2 }
 0x249   :  { %v714_v50 = vpop.f32.mrf.mxu3 }
 0x24a   :  { %v715_v51 = vadd.f32 %v714_v50, %v702_v49 }
 0x251   :  { %v716_v52 = vpop.f32.mrf.mxu3 }
 0x270   :  { %v727_v55 = vpop.f32.mrf.mxu2 }
 0x271   :  { %v728_v60 = vadd.f32 %v727_v55, %v715_v51 }
 0x278   :  { %v729_v56 = vpop.f32.mrf.mxu2 }
 0x290   :  { %v740_v61 = vpop.f32.mrf.mxu3 }
 0x291   :  { %v741_v62 = vadd.f32 %v740_v61, %v728_v60 }
 0x293   :  { %v744_v63 = vmax.f32 %v741_v62, 0.0 }
 0x295   :  { %v745_v0 = vpack.c.bf16 %v744_v63, %v744_v63 }
 0x297   :  { %1079 = vmatmul.msk.bf16.vlgmr.msra.gmra.mxu2 %vm356_vm1, %v745_v0 }
 0x298   :  { %v742_v1 = vpop.f32.mrf.mxu3 }
 0x31a   :  { %v778_v4 = vpop.f32.mrf.mxu2 }
 0x31b   :  { %v779_v5 = vadd.f32 %v1157_v3, %v778_v4 }
 0x31d   :  { %v782_v6 = vmax.f32 %v779_v5, 0.0 }
 0x31f   :  { %v783_v7 = vpack.c.bf16 %v782_v6, %v782_v6 }
 0x321   :  { %1096 = vmatmul.msk.bf16.vlgmr.msra.gmra.mxu3 %vm133_vm0, %v783_v7 }
 0x322   :  { %v780_v8 = vpop.f32.mrf.mxu2 }
 0x3a4   :  { %v832_v12 = vpop.f32.mrf.mxu3 }
 0x3a5   :  { %v833_v13 = vadd.f32 %v1158_v11, %v832_v12 }
 0x3a7   :  { %v839_v14 = vsel %vm838_vm5, %v833_v13, -1e+30 }
 0x3a8   :  { %840 = vmax.xlane.f32.xlu0 %v839_v14 }
 0x3ac   :  { %v834_v15 = vpop.f32.mrf.mxu3 }
 0x41b   :  { %v841_v16 = vpop.xlane.xlu0 %840 }
 0x41c   :  { %v842_v17 = vsub.f32 %v839_v14, %v841_v16 }
 0x41e   :  { %v843_v18 = vmul.f32 1.442695, %v842_v17 }
 0x420   :  { %1159 = vpow2.f32 %v843_v18 }
 0x426   :  { %v1160_v19 = vpop.eup %1159 }
 0x427   :  { %v845_v20 = vsel %vm838_vm5, %v1160_v19, 0.0 }
 0x428   :  { %846 = vadd.xlane.f32.xlu1 %v845_v20 }
 0x49b   :  { %v847_v21 = vpop.xlane.xlu1 %846 }
 0x49c   :  { %1161 = vrcp.f32 %v847_v21 }
 0x49d   :  { %1163 = vlog2.f32 %v847_v21 }
 0x4a2   :  { %v1162_v22 = vpop.eup %1161 }
 0x4a3   :  { %v1164_v23 = vpop.eup %1163  ;;  %v849_v24 = vmul.f32 %v1162_v22, %v845_v20 }
 0x4a4   :  { %v852_v25 = vmul.f32 0.6931472, %v1164_v23 }
 0x4a5   :  { %850 = vst [vmem:[%s1491_s11] sm:$0xff] %v849_v24 }
 0x4a6   :  { %v853_v26 = vsub.f32 %v842_v17, %v852_v25 }
 0x4a8   :  { %854 = vst [vmem:[%s1492_s12] sm:$0xff] %v853_v26 }

</bundles_post_ra>
